<compile_context>
chip_gen: v5e
topology: v5e:2x2
jax: 0.10.0
libtpu: 0.0.40
codegen_flags: <defaults>
</compile_context>

<pallas_src>
import functools

import jax
import jax.numpy as jnp
from jax.experimental import pallas as pl
from jax.experimental.pallas import tpu as pltpu


# ----------------------------------------------------------------------------
# Pallas kernel.  Per (batch n, pixel tile j) grid point, with channel-major
# blocks g (1, Cg, t) / x (1, Cx, t):
#   g1 = Wg @ g                       (conv1x1, BN scale folded into Wg)
#   x1 = Wx @ x
#   h  = relu(g1 + x1 + b_gx)         (b_gx = folded bias of both branches)
#   p  = sigmoid(sum_c wp[c]*h[c] + bp)
#   out = x * p                       (broadcast over channels/sublanes)
# ----------------------------------------------------------------------------
def _attn_block_kernel(g_ref, x_ref, wg_ref, wx_ref, bgx_ref, wp_ref, bp_ref,
                       o_ref):
    # Feed the MXU in the stored dtype (bf16 or f32); accumulate in f32.
    g = g_ref[0]                                                  # (Cg, t)
    x = x_ref[0]                                                  # (Cx, t)

    g1 = jnp.dot(wg_ref[...], g, preferred_element_type=jnp.float32)  # (Co, t)
    x1 = jnp.dot(wx_ref[...], x, preferred_element_type=jnp.float32)  # (Co, t)
    h = jnp.maximum(g1 + x1 + bgx_ref[...], 0.0)                       # ReLU f32

    # psi projection to 1 channel: VPU mul + XLU sublane-reduce (avoid an MXU
    # matmul whose result would use 1 of 128 columns).
    p = jnp.sum(h * wp_ref[...], axis=0, keepdims=True) + bp_ref[...]  # (1, t)
    # sigmoid: exp rides the EUP; exact reciprocal keeps tight tolerance.
    p = pl.reciprocal(1.0 + jnp.exp(-p))

    # Final gate in the I/O dtype (bf16 VPU path on v6e/v7x when streaming bf16).
    o_ref[0] = (x * p.astype(x.dtype)).astype(o_ref.dtype)


# ----------------------------------------------------------------------------
# Wrapper helpers.
# ----------------------------------------------------------------------------
def _fold_bn(w, b, gamma, beta, mean, var, eps=1e-5):
    """Fold eval-mode BatchNorm into a preceding 1x1 conv.

    w: (Cout, Cin) conv weight, b: (Cout,) conv bias.
    Returns (Cout, Cin) matmul weight and (Cout,) bias (channel-major layout).
    """
    s = gamma / jnp.sqrt(var + eps)                 # (Cout,)
    w_f = w * s[:, None]                            # (Cout, Cin)
    b_f = (b - mean) * s + beta                     # (Cout,)
    return w_f.astype(jnp.float32), b_f.astype(jnp.float32)


def _vmem_budget_bytes():
    """Per-generation scoped-VMEM budget for user tiles (leaves Mosaic headroom)."""
    cap = None
    try:
        info = pltpu.get_tpu_info()
        for name in ("vmem_capacity_bytes", "vmem_bytes", "vmem_size_bytes"):
            v = getattr(info, name, None)
            if v:
                cap = int(v)
                break
    except Exception:
        cap = None
    if cap is None:
        cap = 64 * 1024 * 1024                       # conservative (v7x-sized)
    if cap >= 96 * 1024 * 1024:                      # v5e / v6e: 128 MiB VMEM
        return min(int(cap * 0.75), 100 * 1024 * 1024)
    return int(cap * 0.60)                           # v7x: 64 MiB -> ~38 MiB


def _select_pix_tile(hw, cg, cx, cout_pad, io_bytes, budget, n_batch):
    """Pixel-tile width (multiple of 128) derived from a VMEM byte budget."""
    # Per pixel-column VMEM bytes: double-buffered g/x/out I/O tiles + f32 temps
    # (g1, x1, h, p and some slack for operand copies).
    per_col_io = 2 * (cg + 2 * cx) * io_bytes
    per_col_f32 = (4 * cout_pad + cg + 2 * cx + 8) * 4
    per_col = per_col_io + per_col_f32
    usable = max(per_col * 128, budget - (2 << 20))   # keep ~2 MiB headroom
    t = max(128, (usable // per_col) // 128 * 128)
    hw128 = pl.cdiv(hw, 128) * 128
    t = min(t, hw128)
    # v7x megacore: give the "parallel" grid a few steps to shard across 2 TCs.
    want_tiles = pl.cdiv(4, max(1, n_batch))
    if hw128 // t < want_tiles:
        t = min(hw128, max(128, (hw128 // want_tiles) // 128 * 128))
    return int(t)


def attn_block(g, x, params, *, io_dtype=None):
    """g: (N, Cg, H, W), x: (N, Cx, H, W) NCHW (like PyTorch). Returns x's shape."""
    N, Cg, H, W = g.shape
    Nx, Cx, Hx, Wx = x.shape
    assert (N, H, W) == (Nx, Hx, Wx), "g and x must share batch/spatial dims"
    HW = H * W

    wg_f, bg_f = _fold_bn(params["wg"], params["bg"], params["gamma_g"],
                          params["beta_g"], params["mean_g"], params["var_g"])
    wx_f, bx_f = _fold_bn(params["wx"], params["bx"], params["gamma_x"],
                          params["beta_x"], params["mean_x"], params["var_x"])
    wp_f, bp_f = _fold_bn(params["wp"], params["bp"], params["gamma_p"],
                          params["beta_p"], params["mean_p"], params["var_p"])
    Cout = wg_f.shape[0]

    if io_dtype is not None:
        # TODO(synk): a standalone astype costs an extra HBM pass; for peak BW
        # the producer should emit g/x already in the streaming dtype (bf16).
        g = g.astype(io_dtype)
        x = x.astype(io_dtype)
    out_dtype = x.dtype
    io_bytes = jnp.dtype(out_dtype).itemsize

    # MXU takes bf16 natively on every generation: feed weights in the I/O
    # dtype when streaming bf16; accumulation stays f32 inside the kernel.
    mxu_dtype = (jnp.bfloat16
                 if jnp.dtype(out_dtype) == jnp.dtype(jnp.bfloat16)
                 else jnp.float32)
    granule = 16 if jnp.dtype(mxu_dtype).itemsize == 2 else 8
    Cout_pad = pl.cdiv(Cout, granule) * granule

    def pad_rows(a, rows):
        return jnp.pad(a, ((0, rows - a.shape[0]), (0, 0)))

    wg_p = pad_rows(wg_f, Cout_pad).astype(mxu_dtype)          # (Cout_pad, Cg)
    wx_p = pad_rows(wx_f, Cout_pad).astype(mxu_dtype)          # (Cout_pad, Cx)
    bgx = pad_rows((bg_f + bx_f).reshape(Cout, 1), Cout_pad)   # (Cout_pad, 1)
    wp_col = pad_rows(wp_f.reshape(Cout, 1), Cout_pad)         # (Cout_pad, 1)
    bp = bp_f.reshape(1, 1)                                    # (1, 1)

    budget = _vmem_budget_bytes()
    t_pix = _select_pix_tile(HW, Cg, Cx, Cout_pad, io_bytes, budget, N)
    hw_pad = pl.cdiv(HW, t_pix) * t_pix

    # NCHW -> (N, C, H*W): free reshape (no transpose); pixels land on lanes.
    g3 = g.reshape(N, Cg, HW)
    x3 = x.reshape(N, Cx, HW)
    if hw_pad != HW:
        # Zero-pad the partial last pixel tile.  Padded columns produce exact
        # zeros (x * p of a zero x is zero, never NaN) and are sliced away.
        g3 = jnp.pad(g3, ((0, 0), (0, 0), (0, hw_pad - HW)))
        x3 = jnp.pad(x3, ((0, 0), (0, 0), (0, hw_pad - HW)))

    grid = (N, hw_pad // t_pix)

    # TODO(synk): when Cg/Cx are far below the sublane granule (e.g. 4-channel
    # f32), DMA bandwidth is partly spent on sublane padding; folding a batch
    # factor onto the channel axis would recover it but is not implemented.
    g_spec = pl.BlockSpec((1, Cg, t_pix), lambda n, j: (n, 0, j))
    x_spec = pl.BlockSpec((1, Cx, t_pix), lambda n, j: (n, 0, j))
    full2d = lambda a: pl.BlockSpec(a.shape, lambda n, j: (0, 0))

    m_total = N * HW
    cost = pl.CostEstimate(
        flops=2 * m_total * Cout * (Cg + Cx) + 10 * m_total * Cout
              + 4 * m_total * Cx,
        transcendentals=m_total,
        bytes_accessed=(Cg + 2 * Cx) * m_total * io_bytes,
    )

    out3 = pl.pallas_call(
        _attn_block_kernel,
        out_shape=jax.ShapeDtypeStruct((N, Cx, hw_pad), out_dtype),
        grid_spec=pltpu.PrefetchScalarGridSpec(
            num_scalar_prefetch=0,
            grid=grid,
            in_specs=[
                g_spec,                   # g (N, Cg, HW_pad)
                x_spec,                   # x (N, Cx, HW_pad)
                full2d(wg_p),             # Wg folded (Cout_pad, Cg)
                full2d(wx_p),             # Wx folded (Cout_pad, Cx)
                full2d(bgx),              # merged bias (Cout_pad, 1)
                full2d(wp_col),           # Wpsi folded (Cout_pad, 1)
                full2d(bp),               # bpsi folded (1, 1)
            ],
            out_specs=x_spec,
        ),
        compiler_params=pltpu.CompilerParams(
            dimension_semantics=("parallel", "parallel"),
            vmem_limit_bytes=int(budget)),
        cost_estimate=cost,
    )(g3, x3, wg_p, wx_p, bgx, wp_col, bp)

    if hw_pad != HW:
        out3 = out3[:, :, :HW]
    return out3.reshape(N, Cx, H, W)


def attn_block_reference(g, x, params, eps=1e-5):
    """Plain-JAX reference (eval-mode BN), NCHW in/out."""
    def conv_bn(inp, w, b, gamma, beta, mean, var):
        z = jnp.einsum("nchw,oc->nohw", inp, w) + b[None, :, None, None]
        s = gamma / jnp.sqrt(var + eps)
        return z * s[None, :, None, None] + (beta - mean * s)[None, :, None, None]

    g1 = conv_bn(g, params["wg"], params["bg"], params["gamma_g"],
                 params["beta_g"], params["mean_g"], params["var_g"])
    x1 = conv_bn(x, params["wx"], params["bx"], params["gamma_x"],
                 params["beta_x"], params["mean_x"], params["var_x"])
    h = jnp.maximum(g1 + x1, 0.0)
    p = conv_bn(h, params["wp"], params["bp"], params["gamma_p"],
                params["beta_p"], params["mean_p"], params["var_p"])
    p = jax.nn.sigmoid(p)
    return x * p


def init_params(key, ch_in, ch_out):
    ks = jax.random.split(key, 14)
    f32 = jnp.float32
    return {
        # W_g: Conv2d(ch_in, ch_out, 1) + BN(ch_out)
        "wg": jax.random.normal(ks[0], (ch_out, ch_in), f32) * 0.2,
        "bg": jax.random.normal(ks[1], (ch_out,), f32) * 0.1,
        "gamma_g": 1.0 + 0.1 * jax.random.normal(ks[2], (ch_out,), f32),
        "beta_g": 0.1 * jax.random.normal(ks[3], (ch_out,), f32),
        "mean_g": 0.05 * jax.random.normal(ks[4], (ch_out,), f32),
        "var_g": 1.0 + 0.1 * jax.random.uniform(ks[5], (ch_out,), f32),
        # W_x: Conv2d(ch_in, ch_out, 1) + BN(ch_out)
        "wx": jax.random.normal(ks[6], (ch_out, ch_in), f32) * 0.2,
        "bx": jax.random.normal(ks[7], (ch_out,), f32) * 0.1,
        "gamma_x": 1.0 + 0.1 * jax.random.normal(ks[8], (ch_out,), f32),
        "beta_x": 0.1 * jax.random.normal(ks[9], (ch_out,), f32),
        "mean_x": 0.05 * jax.random.normal(ks[10], (ch_out,), f32),
        "var_x": 1.0 + 0.1 * jax.random.uniform(ks[11], (ch_out,), f32),
        # psi: Conv2d(ch_out, 1, 1) + BN(1) + Sigmoid
        "wp": jax.random.normal(ks[12], (1, ch_out), f32) * 0.3,
        "bp": jnp.array([0.05], f32),
        "gamma_p": jnp.array([1.1], f32),
        "beta_p": jnp.array([-0.05], f32),
        "mean_p": jnp.array([0.02], f32),
        "var_p": jnp.array([1.3], f32),
    }


if __name__ == "__main__":
    key = jax.random.PRNGKey(0)

    # Test 1: lane-aligned spatial extent (16x16), Cout multiple of the granule.
    N, CH_IN, CH_OUT, HH, WW = 2, 4, 8, 16, 16
    kg, kx, kp, key = jax.random.split(key, 4)
    g = jax.random.normal(kg, (N, CH_IN, HH, WW), jnp.float32)
    x = jax.random.normal(kx, (N, CH_IN, HH, WW), jnp.float32)
    params = init_params(kp, CH_IN, CH_OUT)

    out = jax.jit(attn_block)(g, x, params)
    out = jax.block_until_ready(out)
    ref = attn_block_reference(g, x, params)
    assert out.shape == (N, CH_IN, HH, WW)
    assert jnp.allclose(out, ref, atol=1e-5, rtol=1e-5)

    # Test 2: awkward spatial extent (10x10 -> padded pixel tile) and Cout not
    # a multiple of the sublane granule (exercises zero-row weight padding).
    N2, C2_IN, C2_OUT, H2, W2 = 2, 4, 6, 10, 10
    kg2, kx2, kp2, key = jax.random.split(key, 4)
    g2 = jax.random.normal(kg2, (N2, C2_IN, H2, W2), jnp.float32)
    x2 = jax.random.normal(kx2, (N2, C2_IN, H2, W2), jnp.float32)
    params2 = init_params(kp2, C2_IN, C2_OUT)

    out2 = jax.jit(attn_block)(g2, x2, params2)
    out2 = jax.block_until_ready(out2)
    ref2 = attn_block_reference(g2, x2, params2)
    assert out2.shape == (N2, C2_IN, H2, W2)
    assert jnp.allclose(out2, ref2, atol=1e-5, rtol=1e-5)

    print("KERNEL_OK")
</pallas_src>

<mosaic_0001>
module attributes {stable_mosaic.version = 11 : i64} {
  func.func @_attn_block_kernel(%arg0: i32, %arg1: i32, %arg2: memref<1x4x128xf32, #tpu.memory_space<vmem>>, %arg3: memref<1x4x128xf32, #tpu.memory_space<vmem>>, %arg4: memref<8x4xf32, #tpu.memory_space<vmem>>, %arg5: memref<8x4xf32, #tpu.memory_space<vmem>>, %arg6: memref<8x1xf32, #tpu.memory_space<vmem>>, %arg7: memref<8x1xf32, #tpu.memory_space<vmem>>, %arg8: memref<1x1xf32, #tpu.memory_space<vmem>>, %arg9: memref<1x4x128xf32, #tpu.memory_space<vmem>>) attributes {dimension_semantics = [#tpu.dimension_semantics<parallel>, #tpu.dimension_semantics<parallel>], iteration_bounds = array<i64: 2, 2>, scalar_prefetch = 0 : i64, scratch_operands = 0 : i64, tpu.core_type = #tpu.core_type<tc>, window_params = [{transform_indices = @transform_0, window_bounds = array<i64: 1, 4, 128>}, {transform_indices = @transform_1, window_bounds = array<i64: 1, 4, 128>}, {pipeline_mode = #tpu.pipeline_mode<synchronous>, transform_indices = @transform_2, window_bounds = array<i64: 8, 4>}, {pipeline_mode = #tpu.pipeline_mode<synchronous>, transform_indices = @transform_3, window_bounds = array<i64: 8, 4>}, {pipeline_mode = #tpu.pipeline_mode<synchronous>, transform_indices = @transform_4, window_bounds = array<i64: 8, 1>}, {pipeline_mode = #tpu.pipeline_mode<synchronous>, transform_indices = @transform_5, window_bounds = array<i64: 8, 1>}, {pipeline_mode = #tpu.pipeline_mode<synchronous>, transform_indices = @transform_6, window_bounds = array<i64: 1, 1>}, {transform_indices = @transform_7, window_bounds = array<i64: 1, 4, 128>}]} {
    %c0 = arith.constant 0 : index
    %c0_0 = arith.constant 0 : index
    %c0_1 = arith.constant 0 : index
    %0 = vector.load %arg2[%c0, %c0_0, %c0_1] : memref<1x4x128xf32, #tpu.memory_space<vmem>>, vector<1x4x128xf32>
    %1 = vector.shape_cast %0 : vector<1x4x128xf32> to vector<4x128xf32>
    %c0_2 = arith.constant 0 : index
    %c0_3 = arith.constant 0 : index
    %c0_4 = arith.constant 0 : index
    %2 = vector.load %arg3[%c0_2, %c0_3, %c0_4] : memref<1x4x128xf32, #tpu.memory_space<vmem>>, vector<1x4x128xf32>
    %3 = vector.shape_cast %2 : vector<1x4x128xf32> to vector<4x128xf32>
    %c0_5 = arith.constant 0 : index
    %c0_6 = arith.constant 0 : index
    %4 = vector.load %arg4[%c0_5, %c0_6] : memref<8x4xf32, #tpu.memory_space<vmem>>, vector<8x4xf32>
    %cst = arith.constant dense<0.000000e+00> : vector<8x128xf32>
    %5 = tpu.matmul %4, %1, %cst {dimension_numbers = #tpu.dot_dimension_numbers<[1], [0], [0], [1], [0, 0, 1, 1], [], []>} : vector<8x4xf32>, vector<4x128xf32>, vector<8x128xf32> -> vector<8x128xf32>
    %c0_7 = arith.constant 0 : index
    %c0_8 = arith.constant 0 : index
    %6 = vector.load %arg5[%c0_7, %c0_8] : memref<8x4xf32, #tpu.memory_space<vmem>>, vector<8x4xf32>
    %cst_9 = arith.constant dense<0.000000e+00> : vector<8x128xf32>
    %7 = tpu.matmul %6, %3, %cst_9 {dimension_numbers = #tpu.dot_dimension_numbers<[1], [0], [0], [1], [0, 0, 1, 1], [], []>} : vector<8x4xf32>, vector<4x128xf32>, vector<8x128xf32> -> vector<8x128xf32>
    %8 = arith.addf %5, %7 : vector<8x128xf32>
    %c0_10 = arith.constant 0 : index
    %c0_11 = arith.constant 0 : index
    %9 = vector.load %arg6[%c0_10, %c0_11] : memref<8x1xf32, #tpu.memory_space<vmem>>, vector<8x1xf32>
    %10 = vector.broadcast %9 : vector<8x1xf32> to vector<8x128xf32>
    %11 = arith.addf %8, %10 : vector<8x128xf32>
    %cst_12 = arith.constant 0.000000e+00 : f32
    %12 = vector.broadcast %cst_12 : f32 to vector<8x128xf32>
    %13 = arith.maximumf %11, %12 : vector<8x128xf32>
    %c0_13 = arith.constant 0 : index
    %c0_14 = arith.constant 0 : index
    %14 = vector.load %arg7[%c0_13, %c0_14] : memref<8x1xf32, #tpu.memory_space<vmem>>, vector<8x1xf32>
    %15 = vector.broadcast %14 : vector<8x1xf32> to vector<8x128xf32>
    %16 = arith.mulf %13, %15 : vector<8x128xf32>
    %cst_15 = arith.constant dense<0.000000e+00> : vector<128xf32>
    %17 = vector.multi_reduction <add>, %16, %cst_15 [0] : vector<8x128xf32> to vector<128xf32>
    %18 = vector.shape_cast %17 : vector<128xf32> to vector<1x128xf32>
    %c0_16 = arith.constant 0 : index
    %c0_17 = arith.constant 0 : index
    %19 = vector.load %arg8[%c0_16, %c0_17] : memref<1x1xf32, #tpu.memory_space<vmem>>, vector<1x1xf32>
    %20 = vector.broadcast %19 : vector<1x1xf32> to vector<1x128xf32>
    %21 = arith.addf %18, %20 : vector<1x128xf32>
    %cst_18 = arith.constant 0.000000e+00 : f32
    %22 = vector.broadcast %cst_18 : f32 to vector<1x128xf32>
    %23 = arith.subf %22, %21 : vector<1x128xf32>
    %24 = math.exp %23 : vector<1x128xf32>
    %cst_19 = arith.constant 1.000000e+00 : f32
    %25 = vector.broadcast %cst_19 : f32 to vector<1x128xf32>
    %26 = arith.addf %25, %24 : vector<1x128xf32>
    %27 = tpu.reciprocal %26 : vector<1x128xf32> -> vector<1x128xf32>
    %28 = vector.broadcast %27 : vector<1x128xf32> to vector<4x128xf32>
    %29 = arith.mulf %3, %28 : vector<4x128xf32>
    %c0_20 = arith.constant 0 : index
    %c0_21 = arith.constant 0 : index
    %c0_22 = arith.constant 0 : index
    %30 = vector.load %arg9[%c0_20, %c0_21, %c0_22] : memref<1x4x128xf32, #tpu.memory_space<vmem>>, vector<1x4x128xf32>
    %31 = vector.shape_cast %30 : vector<1x4x128xf32> to vector<4x128xf32>
    %32 = vector.shape_cast %29 : vector<4x128xf32> to vector<1x4x128xf32>
    tpu.vector_store %arg9[%c0_20, %c0_21, %c0_22], %32 {strides = array<i32>} : memref<1x4x128xf32, #tpu.memory_space<vmem>>, vector<1x4x128xf32>,
    return
  }
  func.func @transform_0(%arg0: i32, %arg1: i32) -> (i32, i32, i32) {
    %c0_i32 = arith.constant 0 : i32
    %c0_i32_0 = arith.constant 0 : i32
    return %arg0, %c0_i32, %arg1 : i32, i32, i32
  }
  func.func @transform_1(%arg0: i32, %arg1: i32) -> (i32, i32, i32) {
    %c0_i32 = arith.constant 0 : i32
    %c0_i32_0 = arith.constant 0 : i32
    return %arg0, %c0_i32, %arg1 : i32, i32, i32
  }
  func.func @transform_2(%arg0: i32, %arg1: i32) -> (i32, i32) {
    %c0_i32 = arith.constant 0 : i32
    %c0_i32_0 = arith.constant 0 : i32
    %c0_i32_1 = arith.constant 0 : i32
    return %c0_i32, %c0_i32_0 : i32, i32
  }
  func.func @transform_3(%arg0: i32, %arg1: i32) -> (i32, i32) {
    %c0_i32 = arith.constant 0 : i32
    %c0_i32_0 = arith.constant 0 : i32
    %c0_i32_1 = arith.constant 0 : i32
    return %c0_i32, %c0_i32_0 : i32, i32
  }
  func.func @transform_4(%arg0: i32, %arg1: i32) -> (i32, i32) {
    %c0_i32 = arith.constant 0 : i32
    %c0_i32_0 = arith.constant 0 : i32
    %c0_i32_1 = arith.constant 0 : i32
    return %c0_i32, %c0_i32_0 : i32, i32
  }
  func.func @transform_5(%arg0: i32, %arg1: i32) -> (i32, i32) {
    %c0_i32 = arith.constant 0 : i32
    %c0_i32_0 = arith.constant 0 : i32
    %c0_i32_1 = arith.constant 0 : i32
    return %c0_i32, %c0_i32_0 : i32, i32
  }
  func.func @transform_6(%arg0: i32, %arg1: i32) -> (i32, i32) {
    %c0_i32 = arith.constant 0 : i32
    %c0_i32_0 = arith.constant 0 : i32
    %c0_i32_1 = arith.constant 0 : i32
    return %c0_i32, %c0_i32_0 : i32, i32
  }
  func.func @transform_7(%arg0: i32, %arg1: i32) -> (i32, i32, i32) {
    %c0_i32 = arith.constant 0 : i32
    %c0_i32_0 = arith.constant 0 : i32
    return %arg0, %c0_i32, %arg1 : i32, i32, i32
  }
}

</mosaic_0001>

<bundles_post_ra>
// kernel: attn_block.1
= control target key start
LH: loop header
LB: loop body
LE: loop exit
PB: predicated region body
PF: predicated region fallthrough
CT: control target
= control target key end

     0   :  { %s702_s26 = smov 0   ;;  %s704_s27 = smov 0   ;;  %s773_s0 = inlined_call_operand.vmem [shape: f32[2,4,256], index: 0, kind: input, shape index: {}]   ;;  %s774_s1 = inlined_call_operand.vmem [shape: f32[2,4,256], index: 1, kind: input, shape index: {}]   ;;  %s775_s2 = inlined_call_operand.vmem [shape: f32[8,4], index: 2, kind: input, shape index: {}]   ;;  %s776_s3 = inlined_call_operand.vmem [shape: f32[8,4], index: 3, kind: input, shape index: {}]   ;;  %s777_s4 = inlined_call_operand.vmem [shape: f32[8,1], index: 4, kind: input, shape index: {}]   ;;  %s778_s5 = inlined_call_operand.vmem [shape: f32[8,1], index: 5, kind: input, shape index: {}]   ;;  %s779_s6 = inlined_call_operand.<no memory space> [shape: f32[1,1], index: 6, kind: input, shape index: {}]   ;;  %s780_s7 = inlined_call_operand.vmem [shape: f32[2,4,256], index: 7, kind: output, shape index: {}]  }
   0x1   :  { %v12_v0 = vstv %s779_s6  ;;  %s706_s28 = smov 0   ;;  %s708_s29 = smov 0  }
   0x2   :  { %13 = vst [vmem:[#allocation2] sm:$0x1] %v12_v0  ;;  %s710_s30 = smov 0  }
   0x3 LB: > { %s28_s6 = sadd.s32 1, %s648_s28  ;;  %s31_s8 = sadd.s32 1, %s652_s29  ;;  %s656_s30 = sphi %s710_s30, %s19_s30   ;;  %s652_s29 = sphi %s708_s29, %s784_s29   ;;  %s648_s28 = sphi %s706_s28, %s783_s28   ;;  %s644_s27 = sphi %s704_s27, %s782_s27   ;;  %s640_s26 = sphi %s702_s26, %s781_s26  }
   0x4   : > { %p29_p0 = scmp.ge.s32.totalorder %s28_s6, 2  ;;  %p558_p1 = scmp.ge.s32.totalorder %s656_s30, 1 }
   0x5   : > { %p273_p2 = scmp.lt.s32.totalorder %s656_s30, 5 }
   0x6   : > { %s786_s6 = smov (%p29_p0, %s28_s6), 0  ;;  %s788_s8 = smov (!%p29_p0, %s31_s8), %s652_s29 }
   0x7   : > { %p274_p3 = pnand %p558_p1, %p273_p2  ;;  %p33_p4 = scmp.ge.s32.totalorder %s788_s8, 2 }
   0x8   : > { %p319_p5 = scmp.lt.s32.totalorder (!%p274_p3), %s644_s27, 1  ;;  %p321_p6 = scmp.lt.s32.totalorder (!%p274_p3), %s640_s26, 1 }
   0x9   : > { %s790_s8 = smov (%p33_p4, %s788_s8), 0  ;;  %277 = sbr.rel (%p274_p3) target bundleno = 203 (0xcb), region = 48 }
   0xe   : > { %v658_v1 = vmov 0   ;;  %v401_v2 = vld [vmem:[%s777_s4] sm:$0xff]  ;;  %s792_s27 = smov (!%p319_p5, %s644_s27), 1  ;;  %s794_s26 = smov (!%p321_p6, %s640_s26), 1  ;;  %vm351_vm0 = vcmask 1043456   ;;  %vm347_vm1 = vcmask 31744  }
   0xf   : > { %612 = vset.pattern.permute.xlu0 %v658_v1  ;;  %613 = vset.pattern.permute.xlu1 %v658_v1  ;;  %v422_v3 = vld [vmem:[#allocation2] sm:$0x1]  ;;  %s559_s11 = sshll.u32 %s792_s27, 1 }
  0x10   : > { %404 = vperm.xlu0 %612, %v401_v2   ;;  %425 = vperm.xlu1 %613, %v422_v3   ;;  %s324_s12 = sadd.s32 %s559_s11, %s794_s26  ;;  %v346_v4 = vld [vmem:[%s776_s3] sm:$0xff] }
  0x11   : > { %s735_s13 = sshll.u32 %s324_s12, 2  ;;  %v345_v6 = vld [vmem:[%s775_s2] sm:$0xff] }
  0x12   : > { %s334_s16 = scalar_lea.vmem %s774_s1, %s735_s13  ;;  %s326_s21 = scalar_lea.vmem %s773_s0, %s735_s13  ;;  %v409_v7 = vld [vmem:[%s778_s5] sm:$0xff] }
  0x13   : > { %v344_v5 = vld [vmem:[%s334_s16] sm:$0xf]  ;;  %s342_s9 = scalar_lea.vmem %s780_s7, %s735_s13 }
  0x14   : > { %565 = vmatpush.msk.msra.mxu0 %vm351_vm0, %v344_v5  ;;  %v343_v8 = vld [vmem:[%s326_s21] sm:$0xf] }
  0x15   : > { %567 = vmatpush.msk.msra.mxu1 %vm351_vm0, %v343_v8  ;;  %566 = vmatmul.msk.f32.vlgmr.msra.gmra.mxu0 %vm347_vm1, %v346_v4 }
  0x16   : > { %568 = vmatmul.msk.f32.vlgmr.msra.gmra.mxu1 %vm347_vm1, %v345_v6 }
  0x18   : > { %412 = vperm.xlu0 %612, %v409_v7  }
  0x82   : > { %v405_v9 = vpop.permute.xlu0 %404  ;;  %v426_v20 = vpop.permute.xlu1 %425 }
  0x83   : > { %v428_v23 = vperm.slane %v426_v20, 0 }
  0x8a   : > { %v413_v15 = vpop.permute.xlu0 %412 }
  0x92   : > { %v372_v10 = vpop.f32.mrf.mxu0 }
  0x93   : > { %v398_v11 = vpop.f32.mrf.mxu1 }
  0x94   : > { %v399_v12 = vadd.f32 %v398_v11, %v372_v10 }
  0x96   : > { %v407_v13 = vadd.f32 %v405_v9, %v399_v12 }
  0x98   : > { %v408_v14 = vmax.f32 %v407_v13, 0.0 }
  0x9a   : > { %v415_v16 = vmul.f32 %v413_v15, %v408_v14 }
  0x9c   : > { %v416_v17 = vrot.slane %v415_v16, 4 }
  0x9e   : > { %v417_v18 = vadd.f32 %v416_v17, %v415_v16 }
  0xa0   : > { %v418_v19 = vrot.slane %v417_v18, 2 }
  0xa2   : > { %v419_v21 = vadd.f32 %v418_v19, %v417_v18 }
  0xa4   : > { %v420_v22 = vrot.slane %v419_v21, 1 }
  0xa6   : > { %v421_v24 = vadd.f32 %v420_v22, %v419_v21 }
  0xa8   : > { %v429_v25 = vadd.f32 %v428_v23, %v421_v24 }
  0xaa   : > { %v430_v26 = vsub.f32 0.0, %v429_v25 }
  0xac   : > { %v431_v27 = vmul.f32 1.442695, %v430_v26 }
  0xae   : > { %614 = vpow2.f32 %v431_v27 }
  0xb4   : > { %v615_v28 = vpop.eup %614 }
  0xb5   : > { %v433_v29 = vadd.f32 1.0, %v615_v28 }
  0xb7   : > { %616 = vrcp.f32 %v433_v29  ;;  %v445_v33 = vand.u32 2147483648, %v433_v29  ;;  %v443_v35 = vand.u32 2147483647, %v433_v29  ;;  %vm439_vm3 = vweird.f32 %v433_v29 }
  0xb9   : > { %v446_v37 = vor.u32 1.1754944e-38, %v445_v33  ;;  %vm444_vm5 = vcmp.eq.f32.partialorder %v443_v35, 8.507059e+37 }
  0xbd   : > { %v617_v30 = vpop.eup %616 }
  0xbe   : > { %v435_v31 = vmul.f32 %v617_v30, %v433_v29  ;;  %vm440_vm2 = vweird.f32 %v617_v30 }
  0xbf   : > { %vm441_vm4 = vmor %vm439_vm3, %vm440_vm2 }
  0xc0   : > { %v436_v32 = vsub.f32 1.0, %v435_v31 }
  0xc2   : > { %v437_v34 = vmul.f32 %v617_v30, %v436_v32 }
  0xc4   : > { %v438_v36 = vadd.f32 %v617_v30, %v437_v34 }
  0xc6   : > { %v442_v38 = vsel %vm441_vm4, %v617_v30, %v438_v36 }
  0xc7   : > { %v447_v39 = vsel %vm444_vm5, %v446_v37, %v442_v38 }
  0xc8   : > { %v448_v40 = vmul.f32 %v447_v39, %v344_v5 }
  0xca   : > { %449 = vst [vmem:[%s342_s9] sm:$0xf] %v448_v40 }
  0xcb PF: > { %s19_s30 = sadd.s32 1, %s656_s30   ;;  %s781_s26 = smov %s648_s28 }
  0xcc   : > { %p16_p7 = scmp.ge.s32.totalorder %s19_s30, 6   ;;  %s782_s27 = smov %s652_s29 }
  0xcd   : > { %s783_s28 = smov %s786_s6  ;;  %s784_s29 = smov %s790_s8 }
  0xce   :  { %18 = sbr.rel (!%p16_p7) target bundleno = 3 (0x3), region = 81 }

</bundles_post_ra>
